<compile_context>
chip_gen: v5e
topology: v5e:2x2
jax: 0.10.0
libtpu: 0.0.40
codegen_flags: <defaults>
</compile_context>

<pallas_src>
import functools

import numpy as np

import jax
import jax.numpy as jnp
from jax.experimental import pallas as pl
from jax.experimental.pallas import tpu as pltpu

_LANE = 128


def _round_up(x, m):
    return (x + m - 1) // m * m


def _tpu_info():
    """Best-effort (vmem_capacity_bytes, tensorcores_per_chip, prefer_core_parallel)."""
    vmem_cap = 64 * 1024 * 1024          # conservative default (v7x floor)
    num_tc = 1
    prefer_core_parallel = False
    kind = ""
    try:
        kind = jax.devices()[0].device_kind.lower()
    except Exception:
        pass
    if "v7" in kind or "7x" in kind:
        vmem_cap, num_tc, prefer_core_parallel = 64 * 1024 * 1024, 2, True
    elif "v5" in kind or "v6" in kind:
        vmem_cap, num_tc = 128 * 1024 * 1024, 1
    elif "v4" in kind:
        vmem_cap, num_tc = 128 * 1024 * 1024, 2   # megacore: plain "parallel"
    try:
        info = pltpu.get_tpu_info()
        cap = getattr(info, "vmem_capacity_bytes", None)
        if isinstance(cap, int) and cap > 0:
            vmem_cap = cap
    except Exception:
        pass
    return vmem_cap, num_tc, prefer_core_parallel


def _span_loss_kernel(logits_ref, label_ref, mask_ref, out_ref, acc_ref, *,
                      num_label, inv_denom):
    # logits_ref: (C, TILE_R, 128)   label_ref/mask_ref: (TILE_R, 128) (narrow dtypes)
    # out_ref: (1, 8, 128) per-chunk partial   acc_ref: (TILE_R, 128) f32 scratch
    step = pl.program_id(1)

    @pl.when(step == 0)
    def _():
        acc_ref[...] = jnp.zeros_like(acc_ref)

    labels = label_ref[...].astype(jnp.int32)       # cast in-kernel (free, per vreg)
    mask = mask_ref[...].astype(jnp.float32)

    if num_label <= 8:
        # Small C: hold all class planes, two cheap VPU passes (fewest EUP exps).
        rows = [logits_ref[c].astype(jnp.float32) for c in range(num_label)]
        m = rows[0]
        for r in rows[1:]:
            m = jnp.maximum(m, r)
        s = jnp.zeros_like(m)
        picked = jnp.zeros_like(m)
        for c, r in enumerate(rows):
            s = s + jnp.exp(r - m)
            picked = picked + jnp.where(labels == c, r, 0.0)
    else:
        # Large C: single online-LSE pass -> ~5 live vregs regardless of C.
        r = logits_ref[0].astype(jnp.float32)
        m = r
        s = jnp.ones_like(r)
        picked = jnp.where(labels == 0, r, 0.0)
        for c in range(1, num_label):
            r = logits_ref[c].astype(jnp.float32)
            m_new = jnp.maximum(m, r)
            s = s * jnp.exp(m - m_new) + jnp.exp(r - m_new)
            picked = picked + jnp.where(labels == c, r, 0.0)
            m = m_new

    # Stable cross-entropy per element, masked; accumulate elementwise
    # (no per-step cross-lane reduction).
    acc_ref[...] += (m + jnp.log(s) - picked) * mask

    @pl.when(step == pl.num_programs(1) - 1)
    def _():
        # Single cross-lane/sublane reduction per chunk, scaled by 1/denom.
        partial = jnp.sum(acc_ref[...]) * inv_denom
        out_ref[...] = jnp.zeros(out_ref.shape, jnp.float32) + partial


def span_loss(span_logits, span_label, seq_mask, num_label,
              logits_transfer_dtype=jnp.bfloat16, max_tile_rows=None):
    """Pallas TPU equivalent of Span_loss.forward.

    `logits_transfer_dtype` is the dtype of the (single, fused) transposed
    logits slab read by the kernel; math is always f32.  Labels / mask are
    consumed at whatever dtype the caller provides (int8 / bool recommended).
    """
    assert span_logits.shape[-1] == num_label
    n = int(span_label.size)                       # B * S * S flattened elements
    inv_denom = 1.0 / float(seq_mask.shape[0])     # PyTorch: seq_mask.size()[0]

    vmem_cap, num_tc, prefer_core_parallel = _tpu_info()

    logit_b = np.dtype(logits_transfer_dtype).itemsize
    lab_b = np.dtype(span_label.dtype).itemsize
    msk_b = np.dtype(seq_mask.dtype).itemsize

    # VMEM footprint of one grid step per 128-element row:
    # double-buffered inputs + single f32 accumulator row.
    bytes_per_row = _LANE * (2 * (num_label * logit_b + lab_b + msk_b) + 4)

    # Generation-aware per-step working-set target: bigger tiles on 128 MiB
    # parts (v5e/v6e), conservative on v7x's 64 MiB VMEM.
    ws_target = (20 << 20) if vmem_cap > (64 << 20) else (8 << 20)
    tile_r = max(32, (ws_target // bytes_per_row) // 32 * 32)   # mult. of 32: int8 tiling
    if max_tile_rows is not None:
        tile_r = min(tile_r, max(32, (max_tile_rows // 32) * 32))

    r_total = -(-n // _LANE)                       # rows of 128 elements
    tile_r = min(tile_r, _round_up(r_total, 32))

    total_tiles = -(-r_total // tile_r)
    num_chunks = num_tc if total_tiles >= num_tc else 1
    steps = -(-total_tiles // num_chunks)
    r_pad = num_chunks * steps * tile_r
    n_pad = r_pad * _LANE

    # ---- Logits: one fused pass (transpose + pad + downcast). ----
    logits = jnp.moveaxis(span_logits, -1, 0).reshape(num_label, n)
    if n_pad != n:
        logits = jnp.pad(logits, ((0, 0), (0, n_pad - n)))
    logits = logits.reshape(num_label, r_pad, _LANE).astype(logits_transfer_dtype)

    # ---- Labels / mask: keep caller dtype, just reshape (+ cheap pad). ----
    labels = span_label.reshape(n)
    mask = seq_mask.reshape(n)
    if n_pad != n:
        labels = jnp.pad(labels, ((0, n_pad - n),))   # padded rows: mask == 0
        mask = jnp.pad(mask, ((0, n_pad - n),))
    labels = labels.reshape(r_pad, _LANE)
    mask = mask.reshape(r_pad, _LANE)

    # ---- VMEM budget (generation-aware, with headroom). ----
    per_step_bytes = bytes_per_row * tile_r + 2 * 8 * _LANE * 4
    vmem_limit = int(min(int(0.6 * vmem_cap), 2 * per_step_bytes + (8 << 20)))
    vmem_limit = max(vmem_limit, 16 << 20)

    kernel = functools.partial(_span_loss_kernel, num_label=num_label,
                               inv_denom=inv_denom)
    grid_spec = pltpu.PrefetchScalarGridSpec(
        num_scalar_prefetch=0,
        grid=(num_chunks, steps),
        in_specs=[
            pl.BlockSpec((num_label, tile_r, _LANE),
                         lambda c, s: (0, c * steps + s, 0)),
            pl.BlockSpec((tile_r, _LANE), lambda c, s: (c * steps + s, 0)),
            pl.BlockSpec((tile_r, _LANE), lambda c, s: (c * steps + s, 0)),
        ],
        out_specs=pl.BlockSpec((1, 8, _LANE), lambda c, s: (c, 0, 0)),
        scratch_shapes=[pltpu.VMEM((tile_r, _LANE), jnp.float32)],
    )
    out_shape = jax.ShapeDtypeStruct((num_chunks, 8, _LANE), jnp.float32)

    def run(dim_semantics):
        return pl.pallas_call(
            kernel,
            out_shape=out_shape,
            grid_spec=grid_spec,
            compiler_params=pltpu.CompilerParams(
                dimension_semantics=dim_semantics,
                vmem_limit_bytes=vmem_limit),
        )(logits, labels, mask)

    if num_chunks > 1 and prefer_core_parallel:
        # v7x: pin the chunk axis onto the two TensorCores explicitly.
        try:
            out = run((pltpu.CORE_PARALLEL, pltpu.ARBITRARY))
        except Exception:
            out = run(("parallel", "arbitrary"))   # toolchain fallback
    elif num_chunks > 1:
        out = run(("parallel", "arbitrary"))       # v4-style megacore
    else:
        out = run(("arbitrary", "arbitrary"))

    # Add the per-chunk partial sums (each already scaled by 1/denom).
    return jnp.sum(out[:, 0, 0])


def _reference(span_logits, span_label, seq_mask, num_label):
    # Plain-JAX reference (PyTorch CrossEntropyLoss semantics).
    logits = span_logits.reshape(-1, num_label).astype(jnp.float32)
    labels = span_label.reshape(-1).astype(jnp.int32)
    mask = seq_mask.reshape(-1).astype(jnp.float32)
    logp = jax.nn.log_softmax(logits, axis=-1)
    loss = -jnp.take_along_axis(logp, labels[:, None], axis=-1)[:, 0]
    return jnp.sum(loss * mask) / seq_mask.shape[0]


if __name__ == "__main__":
    key = jax.random.PRNGKey(0)
    B, S, NUM_LABEL = 2, 48, 4

    k1, k2, k3 = jax.random.split(key, 3)
    span_logits = jax.random.normal(k1, (B, S, S, NUM_LABEL), dtype=jnp.float32)
    # Narrow input dtypes (review item 2): int8 labels, int8 {0,1} mask.
    span_label = jax.random.randint(k2, (B, S, S), 0, NUM_LABEL,
                                    dtype=jnp.int32).astype(jnp.int8)
    seq_mask = jax.random.bernoulli(k3, 0.7, (B, S, S)).astype(jnp.int8)

    ref_f32 = _reference(span_logits, span_label, seq_mask, NUM_LABEL)
    ref_bf16 = _reference(span_logits.astype(jnp.bfloat16).astype(jnp.float32),
                          span_label, seq_mask, NUM_LABEL)

    # 1) Default path: bf16 logits transfer (kernel math in f32).
    out = jax.block_until_ready(span_loss(span_logits, span_label, seq_mask, NUM_LABEL))
    assert jnp.allclose(out, ref_bf16, rtol=1e-4, atol=1e-4), (out, ref_bf16)
    assert jnp.allclose(out, ref_f32, rtol=2e-2, atol=2e-2), (out, ref_f32)

    # 2) f32 transfer + forced small tiles: exercises the multi-step
    #    accumulation path and matches the f32 reference tightly.
    out_multi = jax.block_until_ready(
        span_loss(span_logits, span_label, seq_mask, NUM_LABEL,
                  logits_transfer_dtype=jnp.float32, max_tile_rows=32))
    assert jnp.allclose(out_multi, ref_f32, rtol=1e-4, atol=1e-4), (out_multi, ref_f32)

    # 3) Ragged tail (n not a multiple of 128).
    b1, s1 = 1, 9
    sl = jax.random.normal(k1, (b1, s1, s1, NUM_LABEL), dtype=jnp.float32)
    lb = jax.random.randint(k2, (b1, s1, s1), 0, NUM_LABEL, dtype=jnp.int32).astype(jnp.int8)
    mk = jax.random.bernoulli(k3, 0.7, (b1, s1, s1)).astype(jnp.int8)
    out_tail = jax.block_until_ready(span_loss(sl, lb, mk, NUM_LABEL))
    ref_tail = _reference(sl.astype(jnp.bfloat16).astype(jnp.float32), lb, mk, NUM_LABEL)
    assert jnp.allclose(out_tail, ref_tail, rtol=1e-4, atol=1e-4), (out_tail, ref_tail)

    print("KERNEL_OK")
</pallas_src>

<mosaic_0001>
module attributes {stable_mosaic.version = 11 : i64} {
  func.func @_span_loss_kernel(%arg0: i32, %arg1: i32, %arg2: memref<4x64x128xbf16, #tpu.memory_space<vmem>>, %arg3: memref<64x128xi8, #tpu.memory_space<vmem>>, %arg4: memref<64x128xi8, #tpu.memory_space<vmem>>, %arg5: memref<1x8x128xf32, #tpu.memory_space<vmem>>, %arg6: memref<64x128xf32, #tpu.memory_space<vmem>>) attributes {dimension_semantics = [#tpu.dimension_semantics<arbitrary>, #tpu.dimension_semantics<arbitrary>], iteration_bounds = array<i64: 1, 1>, scalar_prefetch = 0 : i64, scratch_operands = 1 : i64, tpu.core_type = #tpu.core_type<tc>, window_params = [{transform_indices = @transform_0, window_bounds = array<i64: 4, 64, 128>}, {transform_indices = @transform_1, window_bounds = array<i64: 64, 128>}, {transform_indices = @transform_2, window_bounds = array<i64: 64, 128>}, {transform_indices = @transform_3, window_bounds = array<i64: 1, 8, 128>}]} {
    %c0_i32 = arith.constant 0 : i32
    %0 = arith.cmpi eq, %arg1, %c0_i32 : i32
    %1 = arith.extui %0 : i1 to i32
    %c0_i32_0 = arith.constant 0 : i32
    %2 = arith.cmpi ne, %1, %c0_i32_0 : i32
    scf.if %2 {
      %cst_25 = arith.constant 0.000000e+00 : f32
      %66 = vector.broadcast %cst_25 : f32 to vector<64x128xf32>
      %c0_26 = arith.constant 0 : index
      %c0_27 = arith.constant 0 : index
      %67 = vector.load %arg6[%c0_26, %c0_27] : memref<64x128xf32, #tpu.memory_space<vmem>>, vector<64x128xf32>
      tpu.vector_store %arg6[%c0_26, %c0_27], %66 {strides = array<i32>} : memref<64x128xf32, #tpu.memory_space<vmem>>, vector<64x128xf32>,
    } else {
    }
    %c0 = arith.constant 0 : index
    %c0_1 = arith.constant 0 : index
    %3 = vector.load %arg3[%c0, %c0_1] : memref<64x128xi8, #tpu.memory_space<vmem>>, vector<64x128xi8>
    %4 = arith.extsi %3 : vector<64x128xi8> to vector<64x128xi32>
    %c0_2 = arith.constant 0 : index
    %c0_3 = arith.constant 0 : index
    %5 = vector.load %arg4[%c0_2, %c0_3] : memref<64x128xi8, #tpu.memory_space<vmem>>, vector<64x128xi8>
    %6 = arith.sitofp %5 : vector<64x128xi8> to vector<64x128xf32>
    %c0_4 = arith.constant 0 : index
    %c0_5 = arith.constant 0 : index
    %c0_6 = arith.constant 0 : index
    %7 = vector.load %arg2[%c0_4, %c0_5, %c0_6] : memref<4x64x128xbf16, #tpu.memory_space<vmem>>, vector<1x64x128xbf16>
    %8 = vector.shape_cast %7 : vector<1x64x128xbf16> to vector<64x128xbf16>
    %9 = arith.extf %8 : vector<64x128xbf16> to vector<64x128xf32>
    %c1 = arith.constant 1 : index
    %c0_7 = arith.constant 0 : index
    %c0_8 = arith.constant 0 : index
    %10 = vector.load %arg2[%c1, %c0_7, %c0_8] : memref<4x64x128xbf16, #tpu.memory_space<vmem>>, vector<1x64x128xbf16>
    %11 = vector.shape_cast %10 : vector<1x64x128xbf16> to vector<64x128xbf16>
    %12 = arith.extf %11 : vector<64x128xbf16> to vector<64x128xf32>
    %c2 = arith.constant 2 : index
    %c0_9 = arith.constant 0 : index
    %c0_10 = arith.constant 0 : index
    %13 = vector.load %arg2[%c2, %c0_9, %c0_10] : memref<4x64x128xbf16, #tpu.memory_space<vmem>>, vector<1x64x128xbf16>
    %14 = vector.shape_cast %13 : vector<1x64x128xbf16> to vector<64x128xbf16>
    %15 = arith.extf %14 : vector<64x128xbf16> to vector<64x128xf32>
    %c3 = arith.constant 3 : index
    %c0_11 = arith.constant 0 : index
    %c0_12 = arith.constant 0 : index
    %16 = vector.load %arg2[%c3, %c0_11, %c0_12] : memref<4x64x128xbf16, #tpu.memory_space<vmem>>, vector<1x64x128xbf16>
    %17 = vector.shape_cast %16 : vector<1x64x128xbf16> to vector<64x128xbf16>
    %18 = arith.extf %17 : vector<64x128xbf16> to vector<64x128xf32>
    %19 = arith.maximumf %9, %12 : vector<64x128xf32>
    %20 = arith.maximumf %19, %15 : vector<64x128xf32>
    %21 = arith.maximumf %20, %18 : vector<64x128xf32>
    %cst = arith.constant 0.000000e+00 : f32
    %22 = vector.broadcast %cst : f32 to vector<64x128xf32>
    %cst_13 = arith.constant 0.000000e+00 : f32
    %23 = vector.broadcast %cst_13 : f32 to vector<64x128xf32>
    %24 = arith.subf %9, %21 : vector<64x128xf32>
    %25 = math.exp %24 : vector<64x128xf32>
    %26 = arith.addf %22, %25 : vector<64x128xf32>
    %c0_i32_14 = arith.constant 0 : i32
    %27 = vector.broadcast %c0_i32_14 : i32 to vector<64x128xi32>
    %28 = arith.cmpi eq, %4, %27 : vector<64x128xi32>
    %cst_15 = arith.constant 0.000000e+00 : f32
    %29 = vector.broadcast %cst_15 : f32 to vector<64x128xf32>
    %30 = arith.select %28, %9, %29 : vector<64x128xi1>, vector<64x128xf32>
    %31 = arith.addf %23, %30 : vector<64x128xf32>
    %32 = arith.subf %12, %21 : vector<64x128xf32>
    %33 = math.exp %32 : vector<64x128xf32>
    %34 = arith.addf %26, %33 : vector<64x128xf32>
    %c1_i32 = arith.constant 1 : i32
    %35 = vector.broadcast %c1_i32 : i32 to vector<64x128xi32>
    %36 = arith.cmpi eq, %4, %35 : vector<64x128xi32>
    %cst_16 = arith.constant 0.000000e+00 : f32
    %37 = vector.broadcast %cst_16 : f32 to vector<64x128xf32>
    %38 = arith.select %36, %12, %37 : vector<64x128xi1>, vector<64x128xf32>
    %39 = arith.addf %31, %38 : vector<64x128xf32>
    %40 = arith.subf %15, %21 : vector<64x128xf32>
    %41 = math.exp %40 : vector<64x128xf32>
    %42 = arith.addf %34, %41 : vector<64x128xf32>
    %c2_i32 = arith.constant 2 : i32
    %43 = vector.broadcast %c2_i32 : i32 to vector<64x128xi32>
    %44 = arith.cmpi eq, %4, %43 : vector<64x128xi32>
    %cst_17 = arith.constant 0.000000e+00 : f32
    %45 = vector.broadcast %cst_17 : f32 to vector<64x128xf32>
    %46 = arith.select %44, %15, %45 : vector<64x128xi1>, vector<64x128xf32>
    %47 = arith.addf %39, %46 : vector<64x128xf32>
    %48 = arith.subf %18, %21 : vector<64x128xf32>
    %49 = math.exp %48 : vector<64x128xf32>
    %50 = arith.addf %42, %49 : vector<64x128xf32>
    %c3_i32 = arith.constant 3 : i32
    %51 = vector.broadcast %c3_i32 : i32 to vector<64x128xi32>
    %52 = arith.cmpi eq, %4, %51 : vector<64x128xi32>
    %cst_18 = arith.constant 0.000000e+00 : f32
    %53 = vector.broadcast %cst_18 : f32 to vector<64x128xf32>
    %54 = arith.select %52, %18, %53 : vector<64x128xi1>, vector<64x128xf32>
    %55 = arith.addf %47, %54 : vector<64x128xf32>
    %c0_19 = arith.constant 0 : index
    %c0_20 = arith.constant 0 : index
    %56 = vector.load %arg6[%c0_19, %c0_20] : memref<64x128xf32, #tpu.memory_space<vmem>>, vector<64x128xf32>
    %57 = math.log %50 : vector<64x128xf32>
    %58 = arith.addf %21, %57 : vector<64x128xf32>
    %59 = arith.subf %58, %55 : vector<64x128xf32>
    %60 = arith.mulf %59, %6 : vector<64x128xf32>
    %61 = arith.addf %56, %60 : vector<64x128xf32>
    %c0_21 = arith.constant 0 : index
    %c0_22 = arith.constant 0 : index
    %62 = vector.load %arg6[%c0_21, %c0_22] : memref<64x128xf32, #tpu.memory_space<vmem>>, vector<64x128xf32>
    tpu.vector_store %arg6[%c0_21, %c0_22], %61 {strides = array<i32>} : memref<64x128xf32, #tpu.memory_space<vmem>>, vector<64x128xf32>,
    %c0_i32_23 = arith.constant 0 : i32
    %63 = arith.cmpi eq, %arg1, %c0_i32_23 : i32
    %64 = arith.extui %63 : i1 to i32
    %c0_i32_24 = arith.constant 0 : i32
    %65 = arith.cmpi ne, %64, %c0_i32_24 : i32
    scf.if %65 {
      %c0_25 = arith.constant 0 : index
      %c0_26 = arith.constant 0 : index
      %66 = vector.load %arg6[%c0_25, %c0_26] : memref<64x128xf32, #tpu.memory_space<vmem>>, vector<64x128xf32>
      %67 = vector.shape_cast %66 : vector<64x128xf32> to vector<1x64x128xf32>
      %cst_27 = arith.constant dense<0.000000e+00> : vector<1xf32>
      %68 = vector.multi_reduction <add>, %67, %cst_27 [1, 2] : vector<1x64x128xf32> to vector<1xf32>
      %69 = vector.shape_cast %68 : vector<1xf32> to vector<1x1x1xf32>
      %70 = vector.extract %69[0, 0, 0] : f32 from vector<1x1x1xf32>
      %cst_28 = arith.constant 5.000000e-01 : f32
      %71 = arith.mulf %70, %cst_28 : f32
      %cst_29 = arith.constant 0.000000e+00 : f32
      %72 = vector.broadcast %cst_29 : f32 to vector<1x8x128xf32>
      %73 = vector.broadcast %71 : f32 to vector<1x8x128xf32>
      %74 = arith.addf %72, %73 : vector<1x8x128xf32>
      %c0_30 = arith.constant 0 : index
      %c0_31 = arith.constant 0 : index
      %c0_32 = arith.constant 0 : index
      %75 = vector.load %arg5[%c0_30, %c0_31, %c0_32] : memref<1x8x128xf32, #tpu.memory_space<vmem>>, vector<1x8x128xf32>
      tpu.vector_store %arg5[%c0_30, %c0_31, %c0_32], %74 {strides = array<i32>} : memref<1x8x128xf32, #tpu.memory_space<vmem>>, vector<1x8x128xf32>,
    } else {
    }
    return
  }
  func.func @transform_0(%arg0: i32, %arg1: i32) -> (i32, i32, i32) {
    %c1_i32 = arith.constant 1 : i32
    %0 = arith.muli %arg0, %c1_i32 : i32
    %1 = arith.addi %0, %arg1 : i32
    %c0_i32 = arith.constant 0 : i32
    %c0_i32_0 = arith.constant 0 : i32
    %c0_i32_1 = arith.constant 0 : i32
    return %c0_i32, %1, %c0_i32_0 : i32, i32, i32
  }
  func.func @transform_1(%arg0: i32, %arg1: i32) -> (i32, i32) {
    %c1_i32 = arith.constant 1 : i32
    %0 = arith.muli %arg0, %c1_i32 : i32
    %1 = arith.addi %0, %arg1 : i32
    %c0_i32 = arith.constant 0 : i32
    %c0_i32_0 = arith.constant 0 : i32
    return %1, %c0_i32 : i32, i32
  }
  func.func @transform_2(%arg0: i32, %arg1: i32) -> (i32, i32) {
    %c1_i32 = arith.constant 1 : i32
    %0 = arith.muli %arg0, %c1_i32 : i32
    %1 = arith.addi %0, %arg1 : i32
    %c0_i32 = arith.constant 0 : i32
    %c0_i32_0 = arith.constant 0 : i32
    return %1, %c0_i32 : i32, i32
  }
  func.func @transform_3(%arg0: i32, %arg1: i32) -> (i32, i32, i32) {
    %c0_i32 = arith.constant 0 : i32
    %c0_i32_0 = arith.constant 0 : i32
    %c0_i32_1 = arith.constant 0 : i32
    return %arg0, %c0_i32, %c0_i32_0 : i32, i32, i32
  }
}

</mosaic_0001>

<bundles_post_ra>
// kernel: tpu_custom_call.1
= control target key start
LH: loop header
LB: loop body
LE: loop exit
PB: predicated region body
PF: predicated region fallthrough
CT: control target
= control target key end

     0   :  { %8 = vsyncpa [#allocation4], 0  ;;  %s1242_s0 = inlined_call_operand.hbm [shape: bf16[4,64,128], index: 0, kind: input, shape index: {}]   ;;  %s1243_s1 = inlined_call_operand.hbm [shape: s8[64,128], index: 1, kind: input, shape index: {}]   ;;  %s1244_s2 = inlined_call_operand.hbm [shape: s8[64,128], index: 2, kind: input, shape index: {}]   ;;  %s1245_s3 = inlined_call_operand.hbm [shape: f32[1,8,128], index: 3, kind: output, shape index: {}]  }
   0x1   :  { %9 = vsyncpa [#allocation7], 0  ;;  %s36_s14 = sshll.u32 %s1243_s1, 4  ;;  %s37_s14 = int_to_ptr.hbm [resolvable:$true] %s36_s14 }
   0x2   :  { %10 = vsyncpa [#allocation5], 0  ;;  %s816_s15 = smov [#allocation6]   ;;  %s19_s19 = sshll.u32 %s1242_s0, 4  ;;  %s20_s19 = int_to_ptr.hbm [resolvable:$true] %s19_s19 }
   0x3   :  { %s38_s16 = sshll.u32 %s816_s15, 4  ;;  %s817_s20 = smov 128   ;;  %s39_s16 = int_to_ptr.vmem [resolvable:$true] %s38_s16 }
   0x4   :  { %s818_s21 = smov 8   ;;  %s819_s22 = smov [#allocation3]  }
   0x5   :  { %44 = dma.hbm_to_vmem [thread:$0]  %s37_s14, 256, %s39_s16, [#allocation7], %s817_s20, %s817_s20, %s818_s21  }
   0x6   :  { %s21_s23 = sshll.u32 %s819_s22, 4  ;;  %s820_s24 = smov 64   ;;  %s22_s23 = int_to_ptr.vmem [resolvable:$true] %s21_s23 }
   0x7   :  { %s821_s25 = smov 4   ;;  %s53_s27 = sshll.u32 %s1244_s2, 4  ;;  %s54_s27 = int_to_ptr.hbm [resolvable:$true] %s53_s27 }
   0x8   :  { %27 = dma.hbm_to_vmem [thread:$0]  %s20_s19, 2048, %s22_s23, [#allocation4], %s820_s24, %s820_s24, %s821_s25  }
   0x9   :  { %s822_s28 = smov [#allocation8]  }
   0xa   :  { %s55_s29 = sshll.u32 %s822_s28, 4  ;;  %s56_s29 = int_to_ptr.vmem [resolvable:$true] %s55_s29 }
   0xb   :  { %61 = dma.hbm_to_vmem [thread:$0]  %s54_s27, 256, %s56_s29, [#allocation7], %s817_s20, %s817_s20, %s818_s21  }
   0xc   :  { %810 = dma.done.wait [#allocation4], 2048  }
   0xd   :  { %811 = vsyncadd [#allocation4], 4294965248 }
   0xe   :  { %812 = dma.done.wait [#allocation7], 512  }
   0xf   :  { %813 = vsyncadd [#allocation7], 4294966784  ;;  %v549_v0 = vld [vmem:[#allocation3] sm:$0xff]   ;;  %v612_v1 = vld [vmem:[#allocation3 + $0x8] sm:$0xff]   ;;  %s823_s0 = smov [#allocation9]   ;;  %s537_s5 = sshll.u32 %s1245_s3, 4  ;;  %s538_s5 = int_to_ptr.hbm [resolvable:$true] %s537_s5 }
  0x10   :  { %v613_v2 = vld [vmem:[#allocation3 + $0x10] sm:$0xff]   ;;  %v614_v3 = vld [vmem:[#allocation3 + $0x18] sm:$0xff]   ;;  %v565_v4 = vld [vmem:[#allocation3 + $0x20] sm:$0xff]   ;;  %v853_v5 = vunpack.c.l.bf16 %v549_v0  ;;  %v855_v8 = vunpack.c.h.bf16 %v549_v0  ;;  %v857_v9 = vunpack.c.l.bf16 %v612_v1  ;;  %v859_v10 = vunpack.c.h.bf16 %v612_v1  ;;  %s535_s2 = sshll.u32 %s823_s0, 4  ;;  %s536_s2 = int_to_ptr.vmem [resolvable:$true] %s535_s2 }
  0x11   :  { %v615_v6 = vld [vmem:[#allocation3 + $0x28] sm:$0xff]   ;;  %v616_v7 = vld [vmem:[#allocation3 + $0x30] sm:$0xff]   ;;  %v861_v11 = vunpack.c.l.bf16 %v613_v2  ;;  %v617_v12 = vld [vmem:[#allocation3 + $0x38] sm:$0xff]   ;;  %v863_v14 = vunpack.c.h.bf16 %v613_v2  ;;  %v865_v15 = vunpack.c.l.bf16 %v614_v3  ;;  %v867_v16 = vunpack.c.h.bf16 %v614_v3 }
  0x12   :  { %v581_v13 = vld [vmem:[#allocation3 + $0x40] sm:$0xff]   ;;  %v869_v17 = vunpack.c.l.bf16 %v565_v4  ;;  %v618_v18 = vld [vmem:[#allocation3 + $0x48] sm:$0xff]   ;;  %v619_v19 = vld [vmem:[#allocation3 + $0x50] sm:$0xff]   ;;  %v871_v20 = vunpack.c.h.bf16 %v565_v4  ;;  %v873_v21 = vunpack.c.l.bf16 %v615_v6  ;;  %v875_v22 = vunpack.c.h.bf16 %v615_v6 }
  0x13   :  { %v877_v23 = vunpack.c.l.bf16 %v616_v7  ;;  %v620_v24 = vld [vmem:[#allocation3 + $0x58] sm:$0xff]   ;;  %v597_v25 = vld [vmem:[#allocation3 + $0x60] sm:$0xff]   ;;  %v879_v26 = vunpack.c.h.bf16 %v616_v7  ;;  %v881_v27 = vunpack.c.l.bf16 %v617_v12  ;;  %v883_v28 = vunpack.c.h.bf16 %v617_v12  ;;  %v621_v30 = vld [vmem:[#allocation3 + $0x68] sm:$0xff]  }
  0x14   :  { %v885_v29 = vunpack.c.l.bf16 %v581_v13  ;;  %v622_v31 = vld [vmem:[#allocation3 + $0x70] sm:$0xff]   ;;  %v887_v32 = vunpack.c.h.bf16 %v581_v13  ;;  %v889_v33 = vunpack.c.l.bf16 %v618_v18  ;;  %v891_v34 = vunpack.c.h.bf16 %v618_v18  ;;  %v623_v44 = vld [vmem:[#allocation3 + $0x78] sm:$0xff]   ;;  %v92_v53 = vld [vmem:[#allocation6] sm:$0xff] }
  0x15   :  { %v893_v35 = vunpack.c.l.bf16 %v619_v19  ;;  %v895_v36 = vunpack.c.h.bf16 %v619_v19  ;;  %v897_v37 = vunpack.c.l.bf16 %v620_v24  ;;  %v899_v38 = vunpack.c.h.bf16 %v620_v24  ;;  %v93_v58 = vld [vmem:[#allocation6 + $0x8] sm:$0xff]  ;;  %v102_v19 = vld [vmem:[#allocation8] sm:$0xff] }
  0x16   :  { %v901_v39 = vunpack.c.l.bf16 %v597_v25  ;;  %v903_v40 = vunpack.c.h.bf16 %v597_v25  ;;  %v905_v41 = vunpack.c.l.bf16 %v621_v30  ;;  %v907_v42 = vunpack.c.h.bf16 %v621_v30  ;;  %v964_v30 = vld [vmem:[#allocation8 + $0x8] sm:$0xff] }
  0x17   :  { %1270 = vst [vmem:[#allocation13_spill] sm:$0xff] %v897_v37  ;;  %v909_v43 = vunpack.c.l.bf16 %v622_v31  ;;  %v187_v45 = vmax.f32 %v853_v5, %v869_v17  ;;  %v188_v46 = vmax.f32 %v855_v8, %v871_v20  ;;  %v189_v47 = vmax.f32 %v857_v9, %v873_v21 }
  0x18   :  { %1271 = vst [vmem:[#allocation14_spill] sm:$0xff] %v899_v38  ;;  %v190_v48 = vmax.f32 %v859_v10, %v875_v22  ;;  %v191_v49 = vmax.f32 %v861_v11, %v877_v23  ;;  %v192_v50 = vmax.f32 %v863_v14, %v879_v26  ;;  %v193_v51 = vmax.f32 %v865_v15, %v881_v27 }
  0x19   :  { %1272 = vst [vmem:[#allocation15_spill] sm:$0xff] %v901_v39  ;;  %v194_v52 = vmax.f32 %v867_v16, %v883_v28  ;;  %v927_v54 = vunpack.c.h.bf16 %v622_v31  ;;  %v195_v55 = vmax.f32 %v187_v45, %v885_v29  ;;  %v196_v56 = vmax.f32 %v188_v46, %v887_v32 }
  0x1a   :  { %1273 = vst [vmem:[#allocation16_spill] sm:$0xff] %v903_v40  ;;  %v197_v57 = vmax.f32 %v189_v47, %v889_v33  ;;  %v932_v59 = vunpack.c.l.bf16 %v623_v44  ;;  %v198_v60 = vmax.f32 %v190_v48, %v891_v34  ;;  %v199_v61 = vmax.f32 %v191_v49, %v893_v35 }
  0x1b   :  { %1274 = vst [vmem:[#allocation17_spill] sm:$0xff] %v905_v41  ;;  %v200_v62 = vmax.f32 %v192_v50, %v895_v36  ;;  %v937_v63 = vunpack.c.h.bf16 %v623_v44  ;;  %v201_v0 = vmax.f32 %v193_v51, %v897_v37  ;;  %v202_v1 = vmax.f32 %v194_v52, %v899_v38 }
  0x1c   :  { %1275 = vst [vmem:[#allocation18_spill] sm:$0xff] %v907_v42  ;;  %v942_v2 = vmax.f32 %v195_v55, %v901_v39  ;;  %v944_v3 = vunpack.c.0.s8 %v92_v53  ;;  %v946_v4 = vunpack.c.1.s8 %v92_v53  ;;  %v948_v6 = vunpack.c.2.s8 %v92_v53 }
  0x1d   :  { %1276 = vst [vmem:[#allocation19_spill] sm:$0xff] %v909_v43  ;;  %v951_v7 = vmax.f32 %v196_v56, %v903_v40  ;;  %v953_v12 = vunpack.c.3.s8 %v92_v53  ;;  %v955_v13 = vunpack.c.0.s8 %v93_v58  ;;  %v957_v18 = vunpack.c.1.s8 %v93_v58 }
  0x1e   :  { %1277 = vst [vmem:[#allocation20_spill] sm:$0xff] %v927_v54  ;;  %v960_v24 = vmax.f32 %v197_v57, %v905_v41  ;;  %v962_v25 = vunpack.c.2.s8 %v93_v58  ;;  %v967_v31 = vmax.f32 %v198_v60, %v907_v42  ;;  %v970_v44 = vmax.f32 %v199_v61, %v909_v43 }
  0x1f   :  { %1278 = vst [vmem:[#allocation21_spill] sm:$0xff] %v932_v59  ;;  %v973_v45 = vmax.f32 %v200_v62, %v927_v54  ;;  %v975_v46 = vunpack.c.3.s8 %v93_v58  ;;  %v978_v47 = vmax.f32 %v201_v0, %v932_v59  ;;  %v981_v48 = vmax.f32 %v202_v1, %v937_v63 }
  0x20   :  { %1279 = vst [vmem:[#allocation22_spill] sm:$0xff] %v937_v63  ;;  %v211_v49 = vsub.f32 %v853_v5, %v942_v2  ;;  %v104_v50 = vunpack.c.0.s8 %v102_v19  ;;  %v105_v51 = vunpack.c.1.s8 %v102_v19  ;;  %v106_v52 = vunpack.c.2.s8 %v102_v19 }
  0x21   :  { %1280 = vst [vmem:[#allocation23_spill] sm:$0xff] %v964_v30  ;;  %v212_v53 = vsub.f32 %v855_v8, %v951_v7  ;;  %v107_v55 = vunpack.c.3.s8 %v102_v19  ;;  %v108_v56 = vunpack.c.0.s8 %v964_v30  ;;  %v109_v57 = vunpack.c.1.s8 %v964_v30 }
  0x22   :  { %1281 = vst [vmem:[#allocation24_spill] sm:$0xff] %v978_v47  ;;  %v213_v58 = vsub.f32 %v857_v9, %v960_v24  ;;  %v214_v61 = vsub.f32 %v859_v10, %v967_v31  ;;  %v215_v62 = vsub.f32 %v861_v11, %v970_v44  ;;  %v216_v0 = vsub.f32 %v863_v14, %v973_v45 }
  0x23   :  { %1282 = vst [vmem:[#allocation25_spill] sm:$0xff] %v981_v48  ;;  %v217_v19 = vsub.f32 %v865_v15, %v978_v47  ;;  %v218_v63 = vsub.f32 %v867_v16, %v981_v48  ;;  %v219_v59 = vmul.f32 1.442695, %v211_v49  ;;  %v1003_v54 = vcvt.s32.f32 %v104_v50 }
  0x24   :  { %v1005_v60 = vcvt.s32.f32 %v105_v51  ;;  %v1007_v43 = vcvt.s32.f32 %v106_v52  ;;  %v221_v42 = vmul.f32 1.442695, %v212_v53  ;;  %v1009_v41 = vcvt.s32.f32 %v107_v55 }
  0x25   :  { %1283 = vst [vmem:[#allocation26_spill] sm:$0xff] %v1003_v54  ;;  %v1011_v40 = vcvt.s32.f32 %v108_v56  ;;  %v1013_v39 = vcvt.s32.f32 %v109_v57  ;;  %v223_v1 = vmul.f32 1.442695, %v213_v58  ;;  %v225_v30 = vmul.f32 1.442695, %v214_v61 }
  0x26   :  { %1284 = vst [vmem:[#allocation27_spill] sm:$0xff] %v1005_v60  ;;  %v227_v38 = vmul.f32 1.442695, %v215_v62  ;;  %v229_v37 = vmul.f32 1.442695, %v216_v0  ;;  %v267_v49 = vsub.f32 %v869_v17, %v942_v2  ;;  %634 = vpow2.f32 %v219_v59 }
  0x27   :  { %1285 = vst [vmem:[#allocation28_spill] sm:$0xff] %v1007_v43  ;;  %v231_v50 = vmul.f32 1.442695, %v217_v19  ;;  %v233_v51 = vmul.f32 1.442695, %v218_v63  ;;  %v268_v52 = vsub.f32 %v871_v20, %v951_v7  ;;  %636 = vpow2.f32 %v221_v42 }
  0x28   :  { %1286 = vst [vmem:[#allocation29_spill] sm:$0xff] %v1009_v41  ;;  %vm243_vm0 = vcmp.eq.s32.totalorder %v944_v3, 0  ;;  %vm244_vm1 = vcmp.eq.s32.totalorder %v946_v4, 0  ;;  %vm245_vm2 = vcmp.eq.s32.totalorder %v948_v6, 0  ;;  %638 = vpow2.f32 %v223_v1 }
  0x29   :  { %1287 = vst [vmem:[#allocation30_spill] sm:$0xff] %v1011_v40  ;;  %vm246_vm3 = vcmp.eq.s32.totalorder %v953_v12, 0  ;;  %vm247_vm4 = vcmp.eq.s32.totalorder %v955_v13, 0  ;;  %v269_v59 = vsub.f32 %v873_v21, %v960_v24  ;;  %640 = vpow2.f32 %v225_v30 }
  0x2a   :  { %1288 = vst [vmem:[#allocation31_spill] sm:$0xff] %v1013_v39  ;;  %vm248_vm5 = vcmp.eq.s32.totalorder %v957_v18, 0  ;;  %vm249_vm6 = vcmp.eq.s32.totalorder %v962_v25, 0  ;;  %v270_v42 = vsub.f32 %v875_v22, %v967_v31  ;;  %642 = vpow2.f32 %v227_v38 }
  0x2b   :  { %vm250_vm7 = vcmp.eq.s32.totalorder %v975_v46, 0  ;;  %v271_v63 = vsub.f32 %v877_v23, %v970_v44  ;;  %v275_v53 = vmul.f32 1.442695, %v267_v49  ;;  %644 = vpow2.f32 %v229_v37 }
  0x2c   :  { %v251_v55 = vsel %vm243_vm0, %v853_v5, 0.0  ;;  %v272_v30 = vsub.f32 %v879_v26, %v973_v45  ;;  %v277_v56 = vmul.f32 1.442695, %v268_v52  ;;  %v635_v57 = vpop.eup %634  ;;  %646 = vpow2.f32 %v231_v50 }
  0x2d   :  { %v252_v38 = vsel %vm244_vm1, %v855_v8, 0.0  ;;  %v273_v58 = vsub.f32 %v881_v27, %v978_v47  ;;  %v279_v61 = vmul.f32 1.442695, %v269_v59  ;;  %v637_v62 = vpop.eup %636  ;;  %648 = vpow2.f32 %v233_v51 }
  0x2e   :  { %v253_v5 = vsel %vm245_vm2, %v857_v9, 0.0  ;;  %v274_v37 = vsub.f32 %v883_v28, %v981_v48  ;;  %v281_v0 = vmul.f32 1.442695, %v270_v42  ;;  %v1048_v1 = vpop.eup %638  ;;  %v254_v8 = vsel %vm246_vm3, %v859_v10, 0.0 }
  0x2f   :  { %v255_v19 = vsel %vm247_vm4, %v861_v11, 0.0  ;;  %650 = vpow2.f32 %v275_v53  ;;  %v283_v49 = vmul.f32 1.442695, %v271_v63  ;;  %v641_v50 = vpop.eup %640  ;;  %v256_v9 = vsel %vm248_vm5, %v863_v14, 0.0 }
  0x30   :  { %v257_v51 = vsel %vm249_vm6, %v865_v15, 0.0  ;;  %652 = vpow2.f32 %v277_v56  ;;  %v285_v52 = vmul.f32 1.442695, %v272_v30  ;;  %v643_v59 = vpop.eup %642  ;;  %v258_v10 = vsel %vm250_vm7, %v867_v16, 0.0 }
  0x31   :  { %654 = vpow2.f32 %v279_v61  ;;  %v287_v11 = vmul.f32 1.442695, %v273_v58  ;;  %vm299_vm8 = vcmp.eq.s32.totalorder %v944_v3, 1  ;;  %v645_v42 = vpop.eup %644  ;;  %v289_v63 = vmul.f32 1.442695, %v274_v37 }
  0x32   :  { %656 = vpow2.f32 %v281_v0  ;;  %vm300_vm9 = vcmp.eq.s32.totalorder %v946_v4, 1  ;;  %vm301_vm10 = vcmp.eq.s32.totalorder %v948_v6, 1  ;;  %v647_v14 = vpop.eup %646  ;;  %vm302_vm11 = vcmp.eq.s32.totalorder %v953_v12, 1 }
  0x33   :  { %658 = vpow2.f32 %v283_v49  ;;  %vm303_vm12 = vcmp.eq.s32.totalorder %v955_v13, 1  ;;  %vm304_vm13 = vcmp.eq.s32.totalorder %v957_v18, 1  ;;  %v649_v15 = vpop.eup %648  ;;  %vm305_vm14 = vcmp.eq.s32.totalorder %v962_v25, 1 }
  0x34   :  { %660 = vpow2.f32 %v285_v52  ;;  %vm306_vm15 = vcmp.eq.s32.totalorder %v975_v46, 1  ;;  %v307_v16 = vsel %vm299_vm8, %v869_v17, 0.0  ;;  %v308_v30 = vsel %vm300_vm9, %v871_v20, 0.0 }
  0x35   :  { %v651_v53 = vpop.eup %650  ;;  %662 = vpow2.f32 %v287_v11  ;;  %v309_v56 = vsel %vm301_vm10, %v873_v21, 0.0  ;;  %v323_v58 = vsub.f32 %v885_v29, %v942_v2  ;;  %v310_v37 = vsel %vm302_vm11, %v875_v22, 0.0 }
  0x36   :  { %v653_v61 = vpop.eup %652  ;;  %664 = vpow2.f32 %v289_v63  ;;  %v311_v0 = vsel %vm303_vm12, %v877_v23, 0.0  ;;  %v324_v49 = vsub.f32 %v887_v32, %v951_v7  ;;  %v312_v17 = vsel %vm304_vm13, %v879_v26, 0.0 }
  0x37   :  { %v655_v52 = vpop.eup %654  ;;  %v313_v20 = vsel %vm305_vm14, %v881_v27, 0.0  ;;  %v314_v21 = vsel %vm306_vm15, %v883_v28, 0.0  ;;  %v1087_v11 = vadd.f32 %v307_v16, %v251_v55  ;;  %v1089_v63 = vadd.f32 %v651_v53, %v635_v57 }
  0x38   :  { %v657_v39 = vpop.eup %656  ;;  %v1091_v22 = vadd.f32 %v308_v30, %v252_v38  ;;  %v1093_v23 = vadd.f32 %v309_v56, %v253_v5  ;;  %v325_v40 = vsub.f32 %v889_v33, %v960_v24  ;;  %v1097_v43 = vadd.f32 %v310_v37, %v254_v8  ;;  %v1291_v5 = vld [vmem:[#allocation13_spill] sm:$0xff]  ;;  %v1293_v56 = vld [vmem:[#allocation14_spill] sm:$0xff] }
  0x39   :  { %v659_v41 = vpop.eup %658  ;;  %v1099_v26 = vadd.f32 %v311_v0, %v255_v19  ;;  %v326_v27 = vsub.f32 %v891_v34, %v967_v31  ;;  %v327_v28 = vsub.f32 %v893_v35, %v970_v44  ;;  %v1105_v57 = vadd.f32 %v653_v61, %v637_v62 }
  0x3a   :  { %1289 = vst [vmem:[#allocation32_spill] sm:$0xff] %v1097_v43  ;;  %v661_v55 = vpop.eup %660  ;;  %v328_v38 = vsub.f32 %v895_v36, %v973_v45  ;;  %v329_v16 = vsub.f32 %v1291_v5, %v978_v47  ;;  %v331_v53 = vmul.f32 1.442695, %v323_v58  ;;  %v1111_v30 = vadd.f32 %v312_v17, %v256_v9 }
  0x3b   :  { %1290 = vst [vmem:[#allocation33_spill] sm:$0xff] %v1099_v26  ;;  %v663_v8 = vpop.eup %662  ;;  %v1113_v19 = vadd.f32 %v313_v20, %v257_v51  ;;  %v330_v37 = vsub.f32 %v1293_v56, %v981_v48  ;;  %v333_v0 = vmul.f32 1.442695, %v324_v49  ;;  %v1118_v62 = vadd.f32 %v655_v52, %v1048_v1  ;;  %v1299_v52 = vld [vmem:[#allocation20_spill] sm:$0xff] }
  0x3c   :  { %v665_v60 = vpop.eup %664  ;;  %v1120_v61 = vadd.f32 %v657_v39, %v641_v50  ;;  %v1122_v54 = vadd.f32 %v314_v21, %v258_v10  ;;  %v335_v26 = vmul.f32 1.442695, %v325_v40  ;;  %v1124_v43 = vadd.f32 %v659_v41, %v643_v59  ;;  %v1294_v39 = vld [vmem:[#allocation15_spill] sm:$0xff]  ;;  %v1295_v41 = vld [vmem:[#allocation16_spill] sm:$0xff]  ;;  %v1296_v50 = vld [vmem:[#allocation17_spill] sm:$0xff] }
  0x3d   :  { %1292 = vst [vmem:[#allocation13_spill] sm:$0xff] %v1113_v19  ;;  %v1126_v58 = vadd.f32 %v661_v55, %v645_v42  ;;  %v337_v9 = vmul.f32 1.442695, %v326_v27  ;;  %v339_v51 = vmul.f32 1.442695, %v327_v28  ;;  %v1128_v17 = vadd.f32 %v663_v8, %v647_v14  ;;  %v1297_v10 = vld [vmem:[#allocation18_spill] sm:$0xff] }
  0x3e   :  { %666 = vpow2.f32 %v331_v53  ;;  %v341_v20 = vmul.f32 1.442695, %v328_v38  ;;  %v343_v49 = vmul.f32 1.442695, %v329_v16  ;;  %v1130_v19 = vadd.f32 %v665_v60, %v649_v15  ;;  %v1298_v14 = vld [vmem:[#allocation19_spill] sm:$0xff]  ;;  %v1300_v27 = vld [vmem:[#allocation21_spill] sm:$0xff] }
  0x3f   :  { %668 = vpow2.f32 %v333_v0  ;;  %v345_v1 = vmul.f32 1.442695, %v330_v37  ;;  %vm355_vm0 = vcmp.eq.s32.totalorder %v944_v3, 2  ;;  %vm356_vm1 = vcmp.eq.s32.totalorder %v946_v4, 2  ;;  %v1301_v53 = vld [vmem:[#allocation22_spill] sm:$0xff] }
  0x40   :  { %670 = vpow2.f32 %v335_v26  ;;  %vm357_vm2 = vcmp.eq.s32.totalorder %v948_v6, 2  ;;  %vm358_vm3 = vcmp.eq.s32.totalorder %v953_v12, 2  ;;  %vm359_vm4 = vcmp.eq.s32.totalorder %v955_v13, 2 }
  0x41   :  { %672 = vpow2.f32 %v337_v9  ;;  %vm360_vm5 = vcmp.eq.s32.totalorder %v957_v18, 2  ;;  %v379_v40 = vsub.f32 %v1294_v39, %v942_v2  ;;  %v380_v60 = vsub.f32 %v1295_v41, %v951_v7 }
  0x42   :  { %674 = vpow2.f32 %v339_v51  ;;  %v381_v59 = vsub.f32 %v1296_v50, %v960_v24  ;;  %v382_v42 = vsub.f32 %v1297_v10, %v967_v31  ;;  %vm361_vm6 = vcmp.eq.s32.totalorder %v962_v25, 2 }
  0x43   :  { %676 = vpow2.f32 %v341_v20  ;;  %v383_v15 = vsub.f32 %v1298_v14, %v970_v44  ;;  %v384_v21 = vsub.f32 %v1299_v52, %v973_v45  ;;  %v385_v28 = vsub.f32 %v1300_v27, %v978_v47 }
  0x44   :  { %v667_v26 = vpop.eup %666  ;;  %678 = vpow2.f32 %v343_v49  ;;  %v387_v55 = vmul.f32 1.442695, %v379_v40  ;;  %v389_v38 = vmul.f32 1.442695, %v380_v60  ;;  %v386_v8 = vsub.f32 %v1301_v53, %v981_v48 }
  0x45   :  { %v669_v16 = vpop.eup %668  ;;  %680 = vpow2.f32 %v345_v1  ;;  %v391_v37 = vmul.f32 1.442695, %v381_v59  ;;  %v393_v0 = vmul.f32 1.442695, %v382_v42  ;;  %vm362_vm7 = vcmp.eq.s32.totalorder %v975_v46, 2 }
  0x46   :  { %v671_v9 = vpop.eup %670  ;;  %v363_v51 = vsel %vm355_vm0, %v885_v29, 0.0  ;;  %682 = vpow2.f32 %v387_v55  ;;  %v395_v20 = vmul.f32 1.442695, %v383_v15  ;;  %v364_v40 = vsel %vm356_vm1, %v887_v32, 0.0 }
  0x47   :  { %v673_v49 = vpop.eup %672  ;;  %v365_v1 = vsel %vm357_vm2, %v889_v33, 0.0  ;;  %684 = vpow2.f32 %v389_v38  ;;  %v397_v60 = vmul.f32 1.442695, %v384_v21  ;;  %v366_v42 = vsel %vm358_vm3, %v891_v34, 0.0 }
  0x48   :  { %v675_v59 = vpop.eup %674  ;;  %v367_v29 = vsel %vm359_vm4, %v893_v35, 0.0  ;;  %686 = vpow2.f32 %v391_v37  ;;  %v399_v15 = vmul.f32 1.442695, %v385_v28  ;;  %v347_v32 = vadd.f32 %v667_v26, %v1089_v63  ;;  %v1302_v37 = vld [vmem:[#allocation32_spill] sm:$0xff] }
  0x49   :  { %v677_v55 = vpop.eup %676  ;;  %v368_v33 = vsel %vm360_vm5, %v895_v36, 0.0  ;;  %688 = vpow2.f32 %v393_v0  ;;  %v401_v21 = vmul.f32 1.442695, %v386_v8  ;;  %v348_v48 = vadd.f32 %v669_v16, %v1105_v57 }
  0x4a   :  { %v679_v38 = vpop.eup %678  ;;  %v369_v34 = vsel %vm361_vm6, %v1291_v5, 0.0  ;;  %v370_v35 = vsel %vm362_vm7, %v1293_v56, 0.0  ;;  %690 = vpow2.f32 %v395_v20  ;;  %v349_v63 = vadd.f32 %v671_v9, %v1118_v62  ;;  %v1303_v20 = vld [vmem:[#allocation33_spill] sm:$0xff] }
  0x4b   :  { %v681_v28 = vpop.eup %680  ;;  %v371_v26 = vadd.f32 %v363_v51, %v1087_v11  ;;  %v372_v36 = vadd.f32 %v364_v40, %v1091_v22  ;;  %692 = vpow2.f32 %v397_v60  ;;  %v350_v57 = vadd.f32 %v673_v49, %v1120_v61  ;;  %v1304_v51 = vld [vmem:[#allocation13_spill] sm:$0xff] }
  0x4c   :  { %v683_v8 = vpop.eup %682  ;;  %v373_v16 = vadd.f32 %v365_v1, %v1093_v23  ;;  %v374_v5 = vadd.f32 %v366_v42, %v1302_v37  ;;  %694 = vpow2.f32 %v399_v15  ;;  %v351_v56 = vadd.f32 %v675_v59, %v1124_v43 }
  0x4d   :  { %v685_v0 = vpop.eup %684  ;;  %v375_v47 = vadd.f32 %v367_v29, %v1303_v20  ;;  %696 = vpow2.f32 %v401_v21  ;;  %v403_v62 = vadd.f32 %v683_v8, %v347_v32  ;;  %v352_v11 = vadd.f32 %v677_v55, %v1126_v58 }
  0x4e   :  { %v687_v9 = vpop.eup %686  ;;  %v376_v22 = vadd.f32 %v368_v33, %v1111_v30  ;;  %v377_v40 = vadd.f32 %v369_v34, %v1304_v51  ;;  %v404_v61 = vadd.f32 %v685_v0, %v348_v48  ;;  %v353_v23 = vadd.f32 %v679_v38, %v1128_v17  ;;  %v1306_v51 = vld [vmem:[#allocation27_spill] sm:$0xff] }
  0x4f   :  { %v689_v49 = vpop.eup %688  ;;  %v1195_v1 = vadd.f32 %v370_v35, %v1122_v54  ;;  %v405_v60 = vadd.f32 %v687_v9, %v349_v63  ;;  %698 = vlog2.f32 %v403_v62  ;;  %v354_v59 = vadd.f32 %v681_v28, %v1130_v19  ;;  %v1305_v62 = vld [vmem:[#allocation26_spill] sm:$0xff] }
  0x50   :  { %v691_v43 = vpop.eup %690  ;;  %v406_v42 = vadd.f32 %v689_v49, %v350_v57  ;;  %vm411_vm8 = vcmp.eq.s32.totalorder %v944_v3, 3  ;;  %700 = vlog2.f32 %v404_v61  ;;  %vm412_vm9 = vcmp.eq.s32.totalorder %v946_v4, 3 }
  0x51   :  { %v693_v58 = vpop.eup %692  ;;  %v407_v30 = vadd.f32 %v691_v43, %v351_v56  ;;  %vm413_vm10 = vcmp.eq.s32.totalorder %v948_v6, 3  ;;  %702 = vlog2.f32 %v405_v60  ;;  %vm414_vm11 = vcmp.eq.s32.totalorder %v953_v12, 3  ;;  %v1309_v43 = vld [vmem:[#allocation25_spill] sm:$0xff] }
  0x52   :  { %v695_v48 = vpop.eup %694  ;;  %v408_v17 = vadd.f32 %v693_v58, %v352_v11  ;;  %vm415_vm12 = vcmp.eq.s32.totalorder %v955_v13, 3  ;;  %704 = vlog2.f32 %v406_v42  ;;  %vm416_vm13 = vcmp.eq.s32.totalorder %v957_v18, 3 }
  0x53   :  { %v697_v54 = vpop.eup %696  ;;  %v409_v19 = vadd.f32 %v695_v48, %v353_v23  ;;  %v419_v3 = vsel %vm411_vm8, %v1294_v39, 0.0  ;;  %706 = vlog2.f32 %v407_v30  ;;  %vm417_vm14 = vcmp.eq.s32.totalorder %v962_v25, 3  ;;  %v1311_v48 = vld [vmem:[#allocation23_spill] sm:$0xff] }
  0x54   :  { %v410_v29 = vadd.f32 %v697_v54, %v354_v59  ;;  %v420_v4 = vsel %vm412_vm9, %v1295_v41, 0.0  ;;  %708 = vlog2.f32 %v408_v17  ;;  %vm418_vm15 = vcmp.eq.s32.totalorder %v975_v46, 3 }
  0x55   :  { %v699_v15 = vpop.eup %698  ;;  %v421_v12 = vsel %vm413_vm10, %v1296_v50, 0.0  ;;  %v422_v55 = vsel %vm414_vm11, %v1297_v10, 0.0  ;;  %710 = vlog2.f32 %v409_v19  ;;  %v423_v39 = vsel %vm415_vm12, %v1298_v14, 0.0  ;;  %v1313_v19 = vld [vmem:[#allocation30_spill] sm:$0xff] }
  0x56   :  { %v701_v32 = vpop.eup %700  ;;  %v427_v33 = vadd.f32 %v419_v3, %v371_v26  ;;  %v444_v25 = vmul.f32 0.6931472, %v699_v15  ;;  %712 = vlog2.f32 %v410_v29  ;;  %v424_v46 = vsel %vm416_vm13, %v1299_v52, 0.0 }
  0x57   :  { %v703_v41 = vpop.eup %702  ;;  %v425_v21 = vsel %vm417_vm14, %v1300_v27, 0.0  ;;  %v428_v6 = vadd.f32 %v420_v4, %v372_v36  ;;  %v446_v50 = vmul.f32 0.6931472, %v701_v32  ;;  %v426_v10 = vsel %vm418_vm15, %v1301_v53, 0.0 }
  0x58   :  { %v705_v38 = vpop.eup %704  ;;  %v429_v34 = vadd.f32 %v421_v12, %v373_v16  ;;  %v448_v35 = vmul.f32 0.6931472, %v703_v41  ;;  %v459_v13 = vadd.f32 %v444_v25, %v942_v2  ;;  %v430_v28 = vadd.f32 %v422_v55, %v374_v5  ;;  %v1315_v12 = vld [vmem:[#allocation31_spill] sm:$0xff] }
  0x59   :  { %v707_v14 = vpop.eup %706  ;;  %v431_v63 = vadd.f32 %v423_v39, %v375_v47  ;;  %v450_v26 = vmul.f32 0.6931472, %v705_v38  ;;  %v460_v8 = vadd.f32 %v446_v50, %v951_v7  ;;  %v432_v18 = vadd.f32 %v424_v46, %v376_v22 }
  0x5a   :  { %v709_v57 = vpop.eup %708  ;;  %v452_v52 = vmul.f32 0.6931472, %v707_v14  ;;  %v461_v27 = vadd.f32 %v448_v35, %v960_v24  ;;  %v467_v36 = vsub.f32 %v459_v13, %v427_v33  ;;  %v433_v0 = vadd.f32 %v425_v21, %v377_v40  ;;  %v1307_v40 = vld [vmem:[#allocation24_spill] sm:$0xff] }
  0x5b   :  { %v711_v37 = vpop.eup %710  ;;  %v454_v56 = vmul.f32 0.6931472, %v709_v57  ;;  %v462_v53 = vadd.f32 %v450_v26, %v967_v31  ;;  %v468_v16 = vsub.f32 %v460_v8, %v428_v6  ;;  %v434_v61 = vadd.f32 %v426_v10, %v1195_v1  ;;  %v1308_v31 = vld [vmem:[#allocation28_spill] sm:$0xff] }
  0x5c   :  { %v713_v20 = vpop.eup %712  ;;  %v456_v2 = vmul.f32 0.6931472, %v711_v37  ;;  %v463_v5 = vadd.f32 %v452_v52, %v970_v44  ;;  %v469_v47 = vsub.f32 %v461_v27, %v429_v34  ;;  %v475_v9 = vmul.f32 %v467_v36, %v1305_v62  ;;  %v1310_v44 = vld [vmem:[#allocation29_spill] sm:$0xff] }
  0x5d   :  { %v458_v7 = vmul.f32 0.6931472, %v713_v20  ;;  %v464_v11 = vadd.f32 %v454_v56, %v973_v45  ;;  %v470_v22 = vsub.f32 %v462_v53, %v430_v28  ;;  %v476_v24 = vmul.f32 %v468_v16, %v1306_v51 }
  0x5e   :  { %v465_v49 = vadd.f32 %v456_v2, %v1307_v40  ;;  %v471_v23 = vsub.f32 %v463_v5, %v431_v63  ;;  %v477_v60 = vmul.f32 %v469_v47, %v1308_v31  ;;  %v1312_v17 = vunpack.c.2.s8 %v1311_v48 }
  0x5f   :  { %v466_v59 = vadd.f32 %v458_v7, %v1309_v43  ;;  %v472_v42 = vsub.f32 %v464_v11, %v432_v18  ;;  %v478_v58 = vmul.f32 %v470_v22, %v1310_v44  ;;  %v510_v30 = vadd.f32 %v476_v24, %v475_v9 }
  0x60   :  { %v118_v54 = vcvt.s32.f32 %v1312_v17  ;;  %v473_v45 = vsub.f32 %v465_v49, %v433_v0  ;;  %v479_v3 = vmul.f32 %v471_v23, %v1313_v19  ;;  %v1314_v1 = vunpack.c.3.s8 %v1311_v48 }
  0x61   :  { %v511_v29 = vadd.f32 %v510_v30, %v477_v60  ;;  %v474_v15 = vsub.f32 %v466_v59, %v434_v61  ;;  %v480_v55 = vmul.f32 %v472_v42, %v1315_v12 }
  0x62   :  { %v119_v4 = vcvt.s32.f32 %v1314_v1  ;;  %v481_v39 = vmul.f32 %v473_v45, %v118_v54 }
  0x63   :  { %v512_v32 = vadd.f32 %v511_v29, %v478_v58 }
  0x64   :  { %v482_v25 = vmul.f32 %v474_v15, %v119_v4 }
  0x65   :  { %v513_v33 = vadd.f32 %v512_v32, %v479_v3 }
  0x67   :  { %v514_v41 = vadd.f32 %v513_v33, %v480_v55 }
  0x69   :  { %v515_v46 = vadd.f32 %v514_v41, %v481_v39 }
  0x6b   :  { %v516_v21 = vadd.f32 %v515_v46, %v482_v25 }
  0x6d   :  { %517 = vadd.xlane.f32.xlu0 %v516_v21 }
  0xe0   :  { %v518_v6 = vpop.xlane.xlu0 %517 }
  0xe1   :  { %v519_v50 = vrot.slane %v518_v6, 4 }
  0xe3   :  { %v520_v38 = vadd.f32 %v519_v50, %v518_v6 }
  0xe5   :  { %v521_v10 = vrot.slane %v520_v38, 2 }
  0xe7   :  { %v522_v34 = vadd.f32 %v521_v10, %v520_v38 }
  0xe9   :  { %v523_v35 = vrot.slane %v522_v34, 1 }
  0xeb   :  { %v524_v13 = vadd.f32 %v523_v35, %v522_v34 }
  0xed   :  { %624 = vpush %v524_v13 }
 0x11e   :  { %s625_s6 = spop %624 }
 0x11f   :  { %s526_s7 = smul.f32 0.5, %s625_s6 }
 0x121   :  { %v527_v14 = vstv %s526_s7 }
 0x122   :  { %529 = vst [vmem:[#allocation9] sm:$0xff] %v527_v14 }
 0x123   :  { %540 = dma.vmem_to_hbm [thread:$0]  %s536_s2, 128, %s538_s5, [#allocation5]  }
 0x124   :  { %814 = dma.done.wait [#allocation5], 128  }
 0x125   :  { %815 = vsyncadd [#allocation5], 4294967168 }
 0x126   :  { %545 = vsyncpa [#allocation4], 1 }
 0x127   :  { %546 = vsyncpa [#allocation7], 1 }
 0x128   :  { %547 = vsyncpa [#allocation5], 1 }

</bundles_post_ra>
